<compile_context>
chip_gen: v7x
topology: tpu7x:2x2x1
jax: 0.10.0
libtpu: 0.0.40
codegen_flags: <defaults>
</compile_context>

<pallas_src>
import functools

import jax
import jax.numpy as jnp
from jax import lax
from jax.experimental import pallas as pl
from jax.experimental.pallas import tpu as pltpu


def _soft_ce_kernel(x_ref, t_ref, partial_ref, *, total_rows, tile_rows,
                    compute_dtype, row_dtype, cast_rows):
    i = pl.program_id(0)

    # Row validity for this block (last block may be partial).  Only the final
    # per-row loss is masked: reductions are axis=-1 so padded rows cannot leak
    # into valid rows, and the select below discards any inf/nan they produce.
    row_ids = i * tile_rows + lax.broadcasted_iota(jnp.int32, (tile_rows, 1), 0)
    valid = row_ids < total_rows

    # Row max in the native input dtype (bit-exact vs widening first: the cast is
    # exact and max is order-preserving); only the (tile_rows, 1) result widens.
    m = jnp.max(x_ref[...], axis=-1, keepdims=True).astype(compute_dtype)

    xf = x_ref[...].astype(compute_dtype)
    tf = t_ref[...].astype(compute_dtype)

    # Fused soft-target CE:
    #   sum(-t * (x - m - lse)) = (m + lse) * sum(t) - sum(t * x)
    lse = jnp.log(jnp.sum(jnp.exp(xf - m), axis=-1, keepdims=True))      # (tr, 1)
    sum_t = jnp.sum(tf, axis=-1, keepdims=True)                          # (tr, 1)
    sum_tx = jnp.sum(tf * xf, axis=-1, keepdims=True)                    # (tr, 1)
    row_loss = (m + lse) * sum_t - sum_tx

    # PyTorch (loss_fp32 and x.dtype != fp32) casts the per-row loss to x.dtype
    # before the mean.
    if cast_rows:
        row_loss = row_loss.astype(row_dtype)

    # Select (not multiply): 0 * inf == nan would poison the block sum.
    row_loss = jnp.where(valid, row_loss.astype(jnp.float32), 0.0)

    # One partial per block; final sum/N happens in the wrapper so the grid axis
    # stays fully parallel (both TensorCores on v7x).
    partial_ref[...] = jnp.sum(row_loss).reshape(1, 1, 1)


def _pick_tile_rows(n_rows, n_cls, itemsize, vmem_capacity):
    """Largest row tile whose fp32 plane fits a generation-aware VMEM budget."""
    # Sublane alignment for packed dtypes: f32 -> 8, bf16 -> 16, int8/fp8 -> 32.
    align = 8 * max(1, 4 // itemsize)
    if vmem_capacity >= (96 << 20):        # v5e / v6e: 128 MiB physical VMEM
        plane_budget = 6 << 20
    else:                                   # v7x: 64 MiB per TensorCore
        plane_budget = 3 << 20
    tr = max(align, (plane_budget // (n_cls * 4)) // align * align)
    n_aligned = ((n_rows + align - 1) // align) * align
    tr = min(tr, n_aligned)
    # Guarantee >= 2 grid steps when the row count allows it, so the "parallel"
    # axis actually spans both TensorCores on v7x.
    if pl.cdiv(n_rows, tr) < 2 and n_rows > align:
        half = ((n_rows + 1) // 2 + align - 1) // align * align
        tr = max(align, half)
    return tr, align


def cross_entropy_with_soft_target(x, target, *, loss_fp32=True, tile_rows=None):
    """x, target: (N, C).  Returns the scalar mean soft-target CE loss."""
    assert x.shape == target.shape and x.ndim == 2
    N, C = x.shape
    x_itemsize = jnp.dtype(x.dtype).itemsize
    t_itemsize = jnp.dtype(target.dtype).itemsize

    try:
        vmem_capacity = int(pltpu.get_tpu_info().vmem_capacity_bytes)
    except Exception:
        vmem_capacity = 64 << 20   # conservative fallback (v7x per-TC)

    if tile_rows is None:
        tile_rows, _ = _pick_tile_rows(N, C, x_itemsize, vmem_capacity)

    num_blocks = pl.cdiv(N, tile_rows)

    # Triple-buffer inputs only when per-step blocks are small enough that the
    # pipeline is latency- rather than bandwidth-exposed.
    block_bytes = tile_rows * C * max(x_itemsize, t_itemsize)
    use_buffered = (block_bytes < (1 << 20)) and num_blocks >= 3
    n_buf = 3 if use_buffered else 2

    # Scoped-VMEM ask: n_buf buffers per input + fp32 intermediate headroom + slack,
    # capped at 75% of physical VMEM (~48 MiB on v7x, ~96 MiB on v5e/v6e).
    # TODO(synk): vocab-scale C (>= ~64K) would want a second grid axis over C with
    # an online logsumexp; not implemented here.
    vmem_need = (n_buf * tile_rows * C * (x_itemsize + t_itemsize)
                 + 4 * tile_rows * C * 4
                 + (2 << 20))
    vmem_limit = int(min(max(vmem_need, 16 << 20), (vmem_capacity * 3) // 4))

    fp32_compute = loss_fp32 or jnp.dtype(x.dtype) == jnp.dtype(jnp.float32)
    # TODO(synk): for loss_fp32=False with mixed x/target dtypes we compute in the
    # promoted dtype, which is a slight superset of PyTorch's bf16 log_softmax path.
    compute_dtype = (jnp.float32 if fp32_compute
                     else jnp.promote_types(x.dtype, target.dtype))
    cast_rows = loss_fp32 and jnp.dtype(x.dtype) != jnp.dtype(jnp.float32)
    out_dtype = x.dtype if cast_rows else jnp.promote_types(x.dtype, target.dtype)

    kernel = functools.partial(
        _soft_ce_kernel,
        total_rows=N,
        tile_rows=tile_rows,
        compute_dtype=compute_dtype,
        row_dtype=x.dtype,
        cast_rows=cast_rows,
    )

    spec_kwargs = dict(pipeline_mode=pl.Buffered(3)) if use_buffered else {}
    in_spec = pl.BlockSpec((tile_rows, C), lambda i: (i, 0), **spec_kwargs)

    partials = pl.pallas_call(
        kernel,
        out_shape=jax.ShapeDtypeStruct((num_blocks, 1, 1), jnp.float32),
        grid=(num_blocks,),
        in_specs=[in_spec, in_spec],
        out_specs=pl.BlockSpec((1, 1, 1), lambda i: (i, 0, 0)),
        compiler_params=pltpu.CompilerParams(
            dimension_semantics=("parallel",),
            vmem_limit_bytes=vmem_limit,
        ),
    )(x, target)

    # Final mean in fp32 (documented bounded difference vs torch's bf16 .mean()).
    loss = jnp.sum(partials) / jnp.float32(N)
    return loss.astype(out_dtype)


def _reference(x, target, loss_fp32=True):
    if loss_fp32 and x.dtype != jnp.float32:
        log_sm = jax.nn.log_softmax(x.astype(jnp.float32), axis=-1)
        row = jnp.sum(-target.astype(jnp.float32) * log_sm, axis=-1).astype(x.dtype)
    else:
        log_sm = jax.nn.log_softmax(x, axis=-1)
        row = jnp.sum(-target * log_sm, axis=-1)
    return jnp.mean(row)


if __name__ == "__main__":
    key = jax.random.PRNGKey(0)
    k1, k2, k3, k4, k5, k6 = jax.random.split(key, 6)

    # 1) fp32 path, lane-aligned class dim (2 row blocks -> both TCs on v7x).
    N, C = 16, 128
    x = jax.random.normal(k1, (N, C), dtype=jnp.float32)
    target = jax.nn.softmax(jax.random.normal(k2, (N, C), dtype=jnp.float32), axis=-1)
    loss = jax.block_until_ready(cross_entropy_with_soft_target(x, target, loss_fp32=True))
    ref = _reference(x, target, loss_fp32=True)
    assert jnp.allclose(loss, ref, rtol=1e-5, atol=1e-5), (loss, ref)

    # 2) bf16 input + loss_fp32=True (fp32 compute, per-row loss cast back to bf16).
    x_bf = x.astype(jnp.bfloat16)
    t_bf = target.astype(jnp.bfloat16)
    loss_bf = jax.block_until_ready(cross_entropy_with_soft_target(x_bf, t_bf, loss_fp32=True))
    ref_bf = _reference(x_bf, t_bf, loss_fp32=True)
    assert jnp.allclose(
        loss_bf.astype(jnp.float32), ref_bf.astype(jnp.float32), rtol=2e-2, atol=2e-2
    ), (loss_bf, ref_bf)

    # 3) bf16 input + loss_fp32=False (low-precision compute path; compare against
    #    the fp32 ground truth with a bf16-appropriate tolerance).
    loss_bf_lp = jax.block_until_ready(
        cross_entropy_with_soft_target(x_bf, t_bf, loss_fp32=False))
    ref_fp32 = _reference(x, target, loss_fp32=True)
    assert jnp.allclose(
        loss_bf_lp.astype(jnp.float32), ref_fp32.astype(jnp.float32), rtol=5e-2, atol=1e-1
    ), (loss_bf_lp, ref_fp32)

    # 4) Row count not a multiple of the tile: exercises remainder-row masking
    #    (the only select left in the kernel).
    N2, C2 = 13, 128
    x2 = jax.random.normal(k3, (N2, C2), dtype=jnp.float32)
    t2 = jax.nn.softmax(jax.random.normal(k4, (N2, C2), dtype=jnp.float32), axis=-1)
    loss2 = jax.block_until_ready(cross_entropy_with_soft_target(x2, t2, loss_fp32=True))
    ref2 = _reference(x2, t2, loss_fp32=True)
    assert jnp.allclose(loss2, ref2, rtol=1e-5, atol=1e-5), (loss2, ref2)

    # 5) Small-block regime with an explicit tile override: exercises the
    #    pl.Buffered(3) multi-buffered input path (8 blocks of 8 rows each).
    N3, C3 = 64, 128
    x3 = jax.random.normal(k5, (N3, C3), dtype=jnp.float32)
    t3 = jax.nn.softmax(jax.random.normal(k6, (N3, C3), dtype=jnp.float32), axis=-1)
    loss3 = jax.block_until_ready(
        cross_entropy_with_soft_target(x3, t3, loss_fp32=True, tile_rows=8))
    ref3 = _reference(x3, t3, loss_fp32=True)
    assert jnp.allclose(loss3, ref3, rtol=1e-5, atol=1e-5), (loss3, ref3)

    print("KERNEL_OK")
</pallas_src>

<mosaic_0001>
module attributes {stable_mosaic.version = 11 : i64} {
  func.func @_soft_ce_kernel(%arg0: i32, %arg1: memref<8x128xf32, #tpu.memory_space<vmem>>, %arg2: memref<8x128xf32, #tpu.memory_space<vmem>>, %arg3: memref<1x1x1xf32, #tpu.memory_space<vmem>>) attributes {dimension_semantics = [#tpu.dimension_semantics<parallel>], iteration_bounds = array<i64: 2>, scalar_prefetch = 0 : i64, scratch_operands = 0 : i64, tpu.core_type = #tpu.core_type<tc>, window_params = [{transform_indices = @transform_0, window_bounds = array<i64: 8, 128>}, {transform_indices = @transform_1, window_bounds = array<i64: 8, 128>}, {transform_indices = @transform_2, window_bounds = array<i64: 1, 1, 1>}]} {
    %c8_i32 = arith.constant 8 : i32
    %0 = arith.muli %arg0, %c8_i32 : i32
    %1 = tpu.iota {dimensions = array<i32: 0>} : vector<8x1xi32>
    %2 = vector.broadcast %0 : i32 to vector<8x1xi32>
    %3 = arith.addi %2, %1 : vector<8x1xi32>
    %c16_i32 = arith.constant 16 : i32
    %4 = vector.broadcast %c16_i32 : i32 to vector<8x1xi32>
    %5 = arith.cmpi slt, %3, %4 : vector<8x1xi32>
    %c0 = arith.constant 0 : index
    %c0_0 = arith.constant 0 : index
    %6 = vector.load %arg1[%c0, %c0_0] : memref<8x128xf32, #tpu.memory_space<vmem>>, vector<8x128xf32>
    %cst = arith.constant dense<0xFF800000> : vector<8xf32>
    %7 = vector.multi_reduction <maximumf>, %6, %cst [1] : vector<8x128xf32> to vector<8xf32>
    %8 = vector.shape_cast %7 : vector<8xf32> to vector<8x1xf32>
    %c0_1 = arith.constant 0 : index
    %c0_2 = arith.constant 0 : index
    %9 = vector.load %arg1[%c0_1, %c0_2] : memref<8x128xf32, #tpu.memory_space<vmem>>, vector<8x128xf32>
    %c0_3 = arith.constant 0 : index
    %c0_4 = arith.constant 0 : index
    %10 = vector.load %arg2[%c0_3, %c0_4] : memref<8x128xf32, #tpu.memory_space<vmem>>, vector<8x128xf32>
    %11 = vector.broadcast %8 : vector<8x1xf32> to vector<8x128xf32>
    %12 = arith.subf %9, %11 : vector<8x128xf32>
    %13 = math.exp %12 : vector<8x128xf32>
    %cst_5 = arith.constant dense<0.000000e+00> : vector<8xf32>
    %14 = vector.multi_reduction <add>, %13, %cst_5 [1] : vector<8x128xf32> to vector<8xf32>
    %15 = vector.shape_cast %14 : vector<8xf32> to vector<8x1xf32>
    %16 = math.log %15 : vector<8x1xf32>
    %cst_6 = arith.constant dense<0.000000e+00> : vector<8xf32>
    %17 = vector.multi_reduction <add>, %10, %cst_6 [1] : vector<8x128xf32> to vector<8xf32>
    %18 = vector.shape_cast %17 : vector<8xf32> to vector<8x1xf32>
    %19 = arith.mulf %10, %9 : vector<8x128xf32>
    %cst_7 = arith.constant dense<0.000000e+00> : vector<8xf32>
    %20 = vector.multi_reduction <add>, %19, %cst_7 [1] : vector<8x128xf32> to vector<8xf32>
    %21 = vector.shape_cast %20 : vector<8xf32> to vector<8x1xf32>
    %22 = arith.addf %8, %16 : vector<8x1xf32>
    %23 = arith.mulf %22, %18 : vector<8x1xf32>
    %24 = arith.subf %23, %21 : vector<8x1xf32>
    %cst_8 = arith.constant 0.000000e+00 : f32
    %25 = vector.broadcast %cst_8 : f32 to vector<8x1xf32>
    %26 = arith.select %5, %24, %25 : vector<8x1xi1>, vector<8x1xf32>
    %27 = vector.shape_cast %26 : vector<8x1xf32> to vector<1x8x1xf32>
    %cst_9 = arith.constant dense<0.000000e+00> : vector<1xf32>
    %28 = vector.multi_reduction <add>, %27, %cst_9 [1, 2] : vector<1x8x1xf32> to vector<1xf32>
    %29 = vector.shape_cast %28 : vector<1xf32> to vector<1x1x1xf32>
    %30 = vector.extract %29[0, 0, 0] : f32 from vector<1x1x1xf32>
    %31 = vector.broadcast %30 : f32 to vector<1x1x1xf32>
    %c0_10 = arith.constant 0 : index
    %c0_11 = arith.constant 0 : index
    %c0_12 = arith.constant 0 : index
    %32 = vector.load %arg3[%c0_10, %c0_11, %c0_12] : memref<1x1x1xf32, #tpu.memory_space<vmem>>, vector<1x1x1xf32>
    tpu.vector_store %arg3[%c0_10, %c0_11, %c0_12], %31 {strides = array<i32>} : memref<1x1x1xf32, #tpu.memory_space<vmem>>, vector<1x1x1xf32>,
    return
  }
  func.func @transform_0(%arg0: i32) -> (i32, i32) {
    %c0_i32 = arith.constant 0 : i32
    %c0_i32_0 = arith.constant 0 : i32
    return %arg0, %c0_i32 : i32, i32
  }
  func.func @transform_1(%arg0: i32) -> (i32, i32) {
    %c0_i32 = arith.constant 0 : i32
    %c0_i32_0 = arith.constant 0 : i32
    return %arg0, %c0_i32 : i32, i32
  }
  func.func @transform_2(%arg0: i32) -> (i32, i32, i32) {
    %c0_i32 = arith.constant 0 : i32
    %c0_i32_0 = arith.constant 0 : i32
    %c0_i32_1 = arith.constant 0 : i32
    return %arg0, %c0_i32, %c0_i32_0 : i32, i32, i32
  }
}

</mosaic_0001>

<bundles_post_ra>
// kernel: tpu_custom_call.1
= control target key start
LH: loop header
LB: loop body
LE: loop exit
PB: predicated region body
PF: predicated region fallthrough
CT: control target
= control target key end

     0   :  { %7 = vsyncpa [#allocation3], 0  ;;  %s651_s0 = inlined_call_operand.hbm [shape: f32[16,128], index: 0, kind: input, shape index: {}]   ;;  %s652_s1 = inlined_call_operand.hbm [shape: f32[16,128], index: 1, kind: input, shape index: {}]   ;;  %s653_s2 = inlined_call_operand.vmem [shape: f32[2,1,1], index: 2, kind: output, shape index: {}]  }
   0x1   :  { %9 = vsyncpa [#allocation3 + $0x1], 0 }
   0x2   :  { %10 = vsyncpa [#allocation5], 0 }
   0x3   :  { %12 = vsyncpa [#allocation5 + $0x1], 0  ;;  %s496_s9 = smov 0   ;;  %s498_s10 = smov 0  }
   0x4   :  { %s500_s11 = smov 0   ;;  %s502_s12 = smov 0  }
   0x5 LB: > { %s515_s13 = sadd.s32 4294967295, %s477_s12   ;;  %s518_s14 = sadd.s32 1, %s477_s12   ;;  %s477_s12 = sphi %s502_s12, %s665_s12   ;;  %s473_s11 = sphi %s500_s11, %s664_s11   ;;  %s469_s10 = sphi %s498_s10, %s663_s10   ;;  %s465_s9 = sphi %s496_s9, %s662_s9  }
   0x6   : > { %s22_s15 = ssub.s32 %s477_s12, %s518_s14  ;;  %s25_s16 = sadd.s32 1, %s473_s11 }
   0x7   : > { %p23_p0 = scmp.eq.s32.totalorder %s22_s15, 0  ;;  %p32_p1 = scmp.ne.s32.totalorder %s473_s11, %s469_s10 }
   0x8   : > { %p33_p2 = scmp.eq.s32.totalorder %s477_s12, 0  ;;  %p38_p3 = scmp.ne.s32.totalorder %s469_s10, %s465_s9 }
   0x9   : > { %s528_s17 = scalar_select %p23_p0, %s473_s11, %s25_s16  }
   0xa   : > { %p34_p4 = por %p33_p2, %p32_p1  ;;  %p39_p5 = scmp.eq.s32.totalorder %s515_s13, 0 }
   0xb   : > { %p342_p6 = scmp.lt.s32.totalorder %s477_s12, 2  ;;  %s537_s19 = sand.u32 1, %s473_s11  }
   0xc   : > { %p532_p7 = por %p39_p5, %p38_p3  ;;  %s319_s20 = sshll.u32 %s537_s19, 3 }
   0xd   : > { %s320_s21 = sshll.u32 %s477_s12, 7  ;;  %s118_s25 = scalar_lea.vmem [#allocation2], %s319_s20 }
   0xe   : > { %s655_s18 = scalar_select %p532_p7, 1, 0 }
   0xf   : > { %s546_s24 = scalar_lea.hbm %s651_s0, %s320_s21  ;;  %s125_s26 = sshll.u32 %s118_s25, 4  ;;  %s550_s26 = int_to_ptr.vmem [resolvable:$true] %s125_s26 }
  0x10   : > { %p552_p8 = pnand %p342_p6, %p34_p4  ;;  %s115_s28 = scalar_lea.sflag [#allocation3], %s537_s19 }
  0x11   : > { %s379_s29 = scalar_lea.hbm %s546_s24, 128  ;;  %s384_s4 = scalar_lea.hbm %s651_s0, 256 }
  0x12   : > { %p380_p11 = scmp.ne.s32.totalorder %s546_s24, %s379_s29  ;;  %p381_p12 = pneg %p552_p8 }
  0x13   : > { %p385_p1 = scmp.lt.u32.totalorder %s546_s24, %s651_s0  ;;  %p386_p2 = scmp.lt.u32.totalorder %s384_s4, %s379_s29 }
  0x14   : > { %p382_p13 = pnand %p381_p12, %p380_p11  ;;  %p388_p4 = scmp.lt.u32.totalorder %s379_s29, %s546_s24 }
  0x15   : > { %p387_p3 = por %p386_p2, %p385_p1 }
  0x16   : > { %p383_p0 = pneg %p382_p13 }
  0x17   : > { %p389_p5 = por %p388_p4, %p387_p3 }
  0x19   : > { %p390_p6 = pnand %p389_p5, %p383_p0 }
  0x1b   : > { %393 = shalt.err (!%p390_p6)
}
  0x1c   : > { %s394_s7 = scalar_lea.vmem %s550_s26, 128  ;;  %s479_s8 = smov [#allocation2]  }
  0x1d   : > { %p395_p11 = scmp.ne.s32.totalorder %s550_s26, %s394_s7  ;;  %s399_s9 = sshll.u32 %s479_s8, 4  ;;  %s400_s9 = int_to_ptr.vmem [resolvable:$false] %s399_s9 }
  0x1e   : > { %s401_s15 = scalar_lea.vmem %s400_s9, 256  ;;  %p402_p10 = scmp.lt.s32.totalorder %s550_s26, %s400_s9 }
  0x1f   : > { %p397_p13 = pnand %p395_p11, %p381_p12  ;;  %p403_p1 = scmp.lt.s32.totalorder %s401_s15, %s394_s7 }
  0x21   : > { %p398_p9 = pneg %p397_p13  ;;  %p404_p2 = por %p403_p1, %p402_p10 }
  0x23   : > { %p405_p3 = pnand %p404_p2, %p398_p9 }
  0x25   : > { %408 = shalt.err (!%p405_p3)
}
  0x26   : > { %338 = dma.hbm_to_vmem [thread:$0]  (!%p552_p8), %s546_s24, 128, %s550_s26, %s115_s28  }
  0x27   : > { %p657_p0 = scmp.lt.s32.totalorder %s477_s12, 3  ;;  %p658_p4 = scmp.ge.s32.totalorder %s477_s12, 1 }
  0x28   : > { %s597_s25 = scalar_lea.hbm %s652_s1, %s320_s21  ;;  %s136_s29 = scalar_lea.vmem [#allocation4], %s319_s20 }
  0x29   : > { %p588_p5 = pnand %p658_p4, %p657_p0  ;;  %s143_s30 = sshll.u32 %s136_s29, 4  ;;  %s144_s30 = int_to_ptr.vmem [resolvable:$true] %s143_s30 }
  0x2a   : > { %s133_s24 = scalar_lea.sflag [#allocation5], %s537_s19  ;;  %s409_s26 = scalar_lea.hbm %s597_s25, 128 }
  0x2b   : > { %s659_s16 = scalar_select %p588_p5, 1, 0 }
  0x2c   : > { %p410_p9 = scmp.ne.s32.totalorder %s597_s25, %s409_s26  ;;  %s414_s21 = scalar_lea.hbm %s652_s1, 256 }
  0x2d   : > { %p415_p11 = scmp.lt.u32.totalorder %s597_s25, %s652_s1  ;;  %p416_p13 = scmp.lt.u32.totalorder %s414_s21, %s409_s26 }
  0x2e   : > { %p412_p10 = pnand %p410_p9, %p381_p12  ;;  %p418_p2 = scmp.lt.u32.totalorder %s409_s26, %s597_s25 }
  0x2f   : > { %p417_p1 = por %p416_p13, %p415_p11 }
  0x30   : > { %p413_p6 = pneg %p412_p10 }
  0x31   : > { %p419_p3 = por %p418_p2, %p417_p1 }
  0x33   : > { %p420_p0 = pnand %p419_p3, %p413_p6 }
  0x35   : > { %423 = shalt.err (!%p420_p0)
}
  0x36   : > { %s424_s19 = scalar_lea.vmem %s144_s30, 128  ;;  %s480_s20 = smov [#allocation4]  }
  0x37   : > { %p425_p4 = scmp.ne.s32.totalorder %s144_s30, %s424_s19  ;;  %s429_s5 = sshll.u32 %s480_s20, 4  ;;  %s430_s5 = int_to_ptr.vmem [resolvable:$false] %s429_s5 }
  0x38   : > { %s431_s6 = scalar_lea.vmem %s430_s5, 256  ;;  %p432_p7 = scmp.lt.s32.totalorder %s144_s30, %s430_s5 }
  0x39   : > { %p427_p9 = pnand %p425_p4, %p381_p12  ;;  %p433_p5 = scmp.lt.s32.totalorder %s431_s6, %s424_s19 }
  0x3b   : > { %p428_p10 = pneg %p427_p9  ;;  %p434_p11 = por %p433_p5, %p432_p7 }
  0x3d   : > { %p435_p13 = pnand %p434_p11, %p428_p10 }
  0x3f   : > { %438 = shalt.err (!%p435_p13)
}
  0x40   : > { %341 = dma.hbm_to_vmem [thread:$0]  (!%p552_p8), %s597_s25, 128, %s144_s30, %s133_s24  }
  0x41   : > { %p660_p6 = scmp.ne.s32.totalorder %s659_s16, 0 }
  0x42   : > { %s154_s7 = sand.u32 (!%p660_p6), 1, %s469_s10   ;;  %p661_p12 = scmp.ne.s32.totalorder (!%p660_p6), %s655_s18, 0 }
  0x43   : > { %152 = sbr.rel (%p660_p6) target bundleno = 604 (0x25c), region = 28  ;;  %s324_s8 = sshll.u32 (!%p660_p6), %s154_s7, 3 }
  0x44   : > { %s155_s9 = scalar_lea.sflag (!%p660_p6), [#allocation3], %s154_s7  ;;  %s158_s15 = scalar_lea.vmem (!%p660_p6), [#allocation2], %s324_s8 }
  0x4a   : > { %456 = dma.done.wait (%p661_p12), %s155_s9, 128  }
  0x4b   : > { %458 = vsyncadd (%p661_p12), %s155_s9, 4294967168  ;;  %s164_s22 = scalar_lea.sflag [#allocation5], %s154_s7  ;;  %s167_s23 = scalar_lea.vmem [#allocation4], %s324_s8 }
  0x4c   : > { %460 = dma.done.wait (%p661_p12), %s164_s22, 128  }
  0x4d   : > { %462 = vsyncadd (%p661_p12), %s164_s22, 4294967168  ;;  %v200_v0 = vld [vmem:[%s158_s15] sm:$0xff]  ;;  %v203_v1 = vld [vmem:[%s167_s23] sm:$0xff]  ;;  %v195_v8 = vlaneseq  ;;  %s326_s27 = sshll.u32 %s515_s13, 3  ;;  %vm220_vm1 = vcmask 7168   ;;  %p191_p7 = scmp.lt.s32.totalorder %s515_s13, 1 }
  0x4e   : > { %201 = vmax.xlane.f32.xlu0 %v200_v0  ;;  %211 = vadd.xlane.f32.xlu1 %v203_v1  ;;  %v213_v2 = vmul.f32 %v203_v1, %v200_v0  ;;  %v197_v11 = vstv %s326_s27  ;;  %vm232_vm2 = vcmask 0  }
  0x4f   : > { %v196_v10 = vshrl.u32 %v195_v8, 7  ;;  %s667_s13 = smov (!%p191_p7, %s515_s13), 1 }
  0x50   : > { %s193_s25 = scalar_lea.vmem %s653_s2, %s667_s13 }
  0x51   : > { %v198_v14 = vadd.s32 %v197_v11, %v196_v10 }
  0x52   : > { %214 = vadd.xlane.f32.xlu1 %v213_v2 }
  0x53   : > { %vm199_vm0 = vcmp.lt.s32.totalorder %v198_v14, 16 }
  0xdb   : > { %v202_v3 = vpop.xlane.xlu0 %201  ;;  %v212_v9 = vpop.xlane.xlu1 %211 }
  0xdc   : > { %v204_v4 = vsub.f32 %v200_v0, %v202_v3 }
  0xde   : > { %v205_v5 = vmul.f32 1.442695, %v204_v4 }
  0xdf   : > { %v215_v16 = vpop.xlane.xlu1 %214 }
  0xe0   : > { %375 = vpow2.f32 %v205_v5 }
  0xea   : > { %v376_v6 = vpop.eup %375 }
  0xeb   : > { %207 = vadd.xlane.f32.xlu0 %v376_v6 }
 0x178   : > { %v208_v7 = vpop.xlane.xlu0 %207 }
 0x179   : > { %377 = vlog2.f32 %v208_v7 }
 0x183   : > { %v378_v12 = vpop.eup %377 }
 0x184   : > { %v210_v13 = vmul.f32 0.6931472, %v378_v12 }
 0x186   : > { %v216_v15 = vadd.f32 %v210_v13, %v202_v3 }
 0x188   : > { %v217_v17 = vmul.f32 %v216_v15, %v212_v9 }
 0x18a   : > { %v218_v18 = vsub.f32 %v217_v17, %v215_v16 }
 0x18c   : > { %v219_v19 = vsel %vm199_vm0, %v218_v18, 0.0 }
 0x18d   : > { %v221_v20 = vsel %vm220_vm1, %v219_v19, 0.0 }
 0x18e   : > { %222 = vadd.xlane.f32.xlu0 %v221_v20 }
 0x21b   : > { %v223_v21 = vpop.xlane.xlu0 %222 }
 0x21c   : > { %v224_v22 = vrot.slane %v223_v21, 4 }
 0x21e   : > { %v225_v23 = vadd.f32 %v224_v22, %v223_v21 }
 0x220   : > { %v226_v24 = vrot.slane %v225_v23, 2 }
 0x222   : > { %v227_v25 = vadd.f32 %v226_v24, %v225_v23 }
 0x224   : > { %v228_v26 = vrot.slane %v227_v25, 1 }
 0x226   : > { %v229_v27 = vadd.f32 %v228_v26, %v227_v25 }
 0x228   : > { %329 = vpush %v229_v27 }
 0x259   : > { %s330_s29 = spop %329 }
 0x25a   : > { %v231_v28 = vstv %s330_s29 }
 0x25b   : > { %233 = vst.msk [vmem:[%s193_s25] sm:$0x1] %vm232_vm2, %v231_v28 }
 0x25c PF: > { %p15_p8 = scmp.ge.s32.totalorder %s518_s14, 4   ;;  %s662_s9 = smov %s469_s10 }
 0x25d   : > { %s663_s10 = smov %s473_s11  ;;  %s664_s11 = smov %s528_s17 }
 0x25e   : > { %s665_s12 = smov %s518_s14  ;;  %17 = sbr.rel (!%p15_p8) target bundleno = 5 (0x5), region = 81 }
 0x265   :  { %251 = vsyncpa [#allocation3], 1 }
 0x266   :  { %253 = vsyncpa [#allocation3 + $0x1], 1 }
 0x267   :  { %254 = vsyncpa [#allocation5], 1 }
 0x268   :  { %256 = vsyncpa [#allocation5 + $0x1], 1 }

</bundles_post_ra>
